<compile_context>
chip_gen: v5e
topology: v5e:2x2
jax: 0.10.0
libtpu: 0.0.40
codegen_flags: <defaults>
</compile_context>

<pallas_src>
import functools

import jax
import jax.numpy as jnp
from jax.experimental import pallas as pl
from jax.experimental.pallas import tpu as pltpu


def _channel_att2_res_kernel(x_ref, w1_ref, b1_ref, w2_ref, b2_ref, o_ref,
                             *, head, dim):
    # x_ref : (Bb, dim)            row tile
    # w1_ref: (dim, head*dim)      all heads' first Linear, pre-transposed
    # b1_ref: (1, head*dim)
    # w2_ref: (head, dim, dim)     second Linear, pre-transposed per head
    # b2_ref: (head, 1, dim)
    # o_ref : (Bb, head*dim)
    x = x_ref[...].astype(jnp.float32)                              # (Bb, D)

    # Layer 1 for ALL heads as one lane-dense MXU matmul.
    h1 = jnp.tanh(
        jnp.dot(x, w1_ref[...].astype(jnp.float32),
                preferred_element_type=jnp.float32)
        + b1_ref[...].astype(jnp.float32))                          # (Bb, H*D)

    outs = []
    for h in range(head):                                           # static unroll
        hh = h1[:, h * dim:(h + 1) * dim]                           # (Bb, D)
        att = jnp.tanh(
            jnp.dot(hh, w2_ref[h].astype(jnp.float32),
                    preferred_element_type=jnp.float32)
            + b2_ref[h].astype(jnp.float32))                        # (Bb, D)
        outs.append(x + x * att)                                    # residual gate

    # Single dense (Bb, head*dim) store.
    o_ref[...] = jnp.concatenate(outs, axis=-1).astype(o_ref.dtype)


def channel_att2_res(x, w1, b1, w2, b2, *, block_rows=8):
    """x: (..., dim). w1/w2: (head, dim, dim) PyTorch Linear weights (out,in).
    b1/b2: (head, dim). Returns (..., head*dim)."""
    head, dim, _ = w1.shape
    assert x.shape[-1] == dim, (x.shape, dim)

    lead = x.shape[:-1]
    n = 1
    for s in lead:
        n *= s
    x2d = x.reshape(n, dim)

    # Pre-transpose parameters once (outside the kernel) so the kernel does
    # plain x @ W:  w1cat[:, h*dim:(h+1)*dim] = W1_h^T, w2t[h] = W2_h^T.
    w1cat = jnp.transpose(w1, (2, 0, 1)).reshape(dim, head * dim)
    b1cat = b1.reshape(1, head * dim)
    w2t = jnp.transpose(w2, (0, 2, 1))
    b2r = b2.reshape(head, 1, dim)

    # Pad the row count up to a multiple of the tile so every block is dense.
    bb = block_rows
    n_pad = pl.cdiv(n, bb) * bb
    if n_pad != n:
        x2d = jnp.pad(x2d, ((0, n_pad - n), (0, 0)))

    out = pl.pallas_call(
        functools.partial(_channel_att2_res_kernel, head=head, dim=dim),
        out_shape=jax.ShapeDtypeStruct((n_pad, head * dim), x.dtype),
        grid_spec=pltpu.PrefetchScalarGridSpec(
            num_scalar_prefetch=0,
            grid=(n_pad // bb,),
            in_specs=[
                pl.BlockSpec((bb, dim), lambda i: (i, 0)),
                # Grid-invariant params: constant block index -> loaded once.
                pl.BlockSpec((dim, head * dim), lambda i: (0, 0)),
                pl.BlockSpec((1, head * dim), lambda i: (0, 0)),
                pl.BlockSpec((head, dim, dim), lambda i: (0, 0, 0)),
                pl.BlockSpec((head, 1, dim), lambda i: (0, 0, 0)),
            ],
            out_specs=pl.BlockSpec((bb, head * dim), lambda i: (i, 0)),
        ),
        compiler_params=pltpu.CompilerParams(
            dimension_semantics=("parallel",)),
    )(x2d, w1cat, b1cat, w2t, b2r)

    out = out[:n]
    return out.reshape(*lead, head * dim)


def channel_att2_res_forward(w1, b1, w2, b2, x1, x2=None, x3=None, x4=None,
                             x5=None):
    """Mirrors the module's forward signature; the optional concat over
    x1..x5 is a pure layout op done in XLA before the kernel."""
    xs = [v for v in (x1, x2, x3, x4, x5) if v is not None]
    x = xs[0] if len(xs) == 1 else jnp.concatenate(xs, axis=-1)
    return channel_att2_res(x, w1, b1, w2, b2)


def channel_att2_res_reference(x, w1, b1, w2, b2):
    # Pure-JAX reference mirroring the PyTorch forward exactly.
    head = w1.shape[0]
    outs = []
    for h in range(head):
        a = jnp.tanh(jnp.matmul(x, w1[h].T) + b1[h])
        a = jnp.tanh(jnp.matmul(a, w2[h].T) + b2[h])
        outs.append(a * x + x)
    return jnp.concatenate(outs, axis=-1)


if __name__ == "__main__":
    # Small shapes consistent with the module: batch=2, seq=8, hidden(dim)=32,
    # head=8 (the module default). Flattened rows = 16 -> 2 grid steps of 8.
    B, T, dim, head = 2, 8, 32, 8

    key = jax.random.PRNGKey(0)
    kx, k1, kb1, k2, kb2 = jax.random.split(key, 5)

    x1 = jax.random.normal(kx, (B, T, dim), dtype=jnp.float32)
    bound = 1.0 / (dim ** 0.5)   # nn.Linear default-ish uniform init
    w1 = jax.random.uniform(k1, (head, dim, dim), minval=-bound, maxval=bound,
                            dtype=jnp.float32)
    b1 = jax.random.uniform(kb1, (head, dim), minval=-bound, maxval=bound,
                            dtype=jnp.float32)
    w2 = jax.random.uniform(k2, (head, dim, dim), minval=-bound, maxval=bound,
                            dtype=jnp.float32)
    b2 = jax.random.uniform(kb2, (head, dim), minval=-bound, maxval=bound,
                            dtype=jnp.float32)

    out = channel_att2_res_forward(w1, b1, w2, b2, x1)
    out = jax.block_until_ready(out)

    ref = channel_att2_res_reference(x1, w1, b1, w2, b2)
    assert out.shape == (B, T, head * dim), out.shape
    max_err = jnp.max(jnp.abs(out - ref))
    assert jnp.allclose(out, ref, atol=1e-5, rtol=1e-5), max_err
    print("KERNEL_OK")
</pallas_src>

<mosaic_0001>
module attributes {stable_mosaic.version = 11 : i64} {
  func.func @_channel_att2_res_kernel(%arg0: i32, %arg1: memref<8x32xf32, #tpu.memory_space<vmem>>, %arg2: memref<32x256xf32, #tpu.memory_space<vmem>>, %arg3: memref<1x256xf32, #tpu.memory_space<vmem>>, %arg4: memref<8x32x32xf32, #tpu.memory_space<vmem>>, %arg5: memref<8x1x32xf32, #tpu.memory_space<vmem>>, %arg6: memref<8x256xf32, #tpu.memory_space<vmem>>) attributes {dimension_semantics = [#tpu.dimension_semantics<parallel>], iteration_bounds = array<i64: 2>, scalar_prefetch = 0 : i64, scratch_operands = 0 : i64, tpu.core_type = #tpu.core_type<tc>, window_params = [{transform_indices = @transform_0, window_bounds = array<i64: 8, 32>}, {pipeline_mode = #tpu.pipeline_mode<synchronous>, transform_indices = @transform_1, window_bounds = array<i64: 32, 256>}, {pipeline_mode = #tpu.pipeline_mode<synchronous>, transform_indices = @transform_2, window_bounds = array<i64: 1, 256>}, {pipeline_mode = #tpu.pipeline_mode<synchronous>, transform_indices = @transform_3, window_bounds = array<i64: 8, 32, 32>}, {pipeline_mode = #tpu.pipeline_mode<synchronous>, transform_indices = @transform_4, window_bounds = array<i64: 8, 1, 32>}, {transform_indices = @transform_5, window_bounds = array<i64: 8, 256>}]} {
    %c0 = arith.constant 0 : index
    %c0_0 = arith.constant 0 : index
    %0 = vector.load %arg1[%c0, %c0_0] : memref<8x32xf32, #tpu.memory_space<vmem>>, vector<8x32xf32>
    %c0_1 = arith.constant 0 : index
    %c0_2 = arith.constant 0 : index
    %1 = vector.load %arg2[%c0_1, %c0_2] : memref<32x256xf32, #tpu.memory_space<vmem>>, vector<32x256xf32>
    %cst = arith.constant dense<0.000000e+00> : vector<8x256xf32>
    %2 = tpu.matmul %0, %1, %cst {dimension_numbers = #tpu.dot_dimension_numbers<[1], [0], [0], [1], [0, 0, 1, 1], [], []>} : vector<8x32xf32>, vector<32x256xf32>, vector<8x256xf32> -> vector<8x256xf32>
    %c0_3 = arith.constant 0 : index
    %c0_4 = arith.constant 0 : index
    %3 = vector.load %arg3[%c0_3, %c0_4] : memref<1x256xf32, #tpu.memory_space<vmem>>, vector<1x256xf32>
    %4 = vector.broadcast %3 : vector<1x256xf32> to vector<8x256xf32>
    %5 = arith.addf %2, %4 : vector<8x256xf32>
    %6 = math.tanh %5 : vector<8x256xf32>
    %7 = vector.extract_strided_slice %6 {offsets = [0, 0], sizes = [8, 32], strides = [1, 1]} : vector<8x256xf32> to vector<8x32xf32>
    %c0_5 = arith.constant 0 : index
    %c0_6 = arith.constant 0 : index
    %c0_7 = arith.constant 0 : index
    %8 = vector.load %arg4[%c0_5, %c0_6, %c0_7] : memref<8x32x32xf32, #tpu.memory_space<vmem>>, vector<1x32x32xf32>
    %9 = vector.shape_cast %8 : vector<1x32x32xf32> to vector<32x32xf32>
    %cst_8 = arith.constant dense<0.000000e+00> : vector<8x32xf32>
    %10 = tpu.matmul %7, %9, %cst_8 {dimension_numbers = #tpu.dot_dimension_numbers<[1], [0], [0], [1], [0, 0, 1, 1], [], []>} : vector<8x32xf32>, vector<32x32xf32>, vector<8x32xf32> -> vector<8x32xf32>
    %c0_9 = arith.constant 0 : index
    %c0_10 = arith.constant 0 : index
    %c0_11 = arith.constant 0 : index
    %11 = vector.load %arg5[%c0_9, %c0_10, %c0_11] : memref<8x1x32xf32, #tpu.memory_space<vmem>>, vector<1x1x32xf32>
    %12 = vector.shape_cast %11 : vector<1x1x32xf32> to vector<1x32xf32>
    %13 = vector.broadcast %12 : vector<1x32xf32> to vector<8x32xf32>
    %14 = arith.addf %10, %13 : vector<8x32xf32>
    %15 = math.tanh %14 : vector<8x32xf32>
    %16 = arith.mulf %0, %15 : vector<8x32xf32>
    %17 = arith.addf %0, %16 : vector<8x32xf32>
    %18 = vector.extract_strided_slice %6 {offsets = [0, 32], sizes = [8, 32], strides = [1, 1]} : vector<8x256xf32> to vector<8x32xf32>
    %c1 = arith.constant 1 : index
    %c0_12 = arith.constant 0 : index
    %c0_13 = arith.constant 0 : index
    %19 = vector.load %arg4[%c1, %c0_12, %c0_13] : memref<8x32x32xf32, #tpu.memory_space<vmem>>, vector<1x32x32xf32>
    %20 = vector.shape_cast %19 : vector<1x32x32xf32> to vector<32x32xf32>
    %cst_14 = arith.constant dense<0.000000e+00> : vector<8x32xf32>
    %21 = tpu.matmul %18, %20, %cst_14 {dimension_numbers = #tpu.dot_dimension_numbers<[1], [0], [0], [1], [0, 0, 1, 1], [], []>} : vector<8x32xf32>, vector<32x32xf32>, vector<8x32xf32> -> vector<8x32xf32>
    %c1_15 = arith.constant 1 : index
    %c0_16 = arith.constant 0 : index
    %c0_17 = arith.constant 0 : index
    %22 = vector.load %arg5[%c1_15, %c0_16, %c0_17] : memref<8x1x32xf32, #tpu.memory_space<vmem>>, vector<1x1x32xf32>
    %23 = vector.shape_cast %22 : vector<1x1x32xf32> to vector<1x32xf32>
    %24 = vector.broadcast %23 : vector<1x32xf32> to vector<8x32xf32>
    %25 = arith.addf %21, %24 : vector<8x32xf32>
    %26 = math.tanh %25 : vector<8x32xf32>
    %27 = arith.mulf %0, %26 : vector<8x32xf32>
    %28 = arith.addf %0, %27 : vector<8x32xf32>
    %29 = vector.extract_strided_slice %6 {offsets = [0, 64], sizes = [8, 32], strides = [1, 1]} : vector<8x256xf32> to vector<8x32xf32>
    %c2 = arith.constant 2 : index
    %c0_18 = arith.constant 0 : index
    %c0_19 = arith.constant 0 : index
    %30 = vector.load %arg4[%c2, %c0_18, %c0_19] : memref<8x32x32xf32, #tpu.memory_space<vmem>>, vector<1x32x32xf32>
    %31 = vector.shape_cast %30 : vector<1x32x32xf32> to vector<32x32xf32>
    %cst_20 = arith.constant dense<0.000000e+00> : vector<8x32xf32>
    %32 = tpu.matmul %29, %31, %cst_20 {dimension_numbers = #tpu.dot_dimension_numbers<[1], [0], [0], [1], [0, 0, 1, 1], [], []>} : vector<8x32xf32>, vector<32x32xf32>, vector<8x32xf32> -> vector<8x32xf32>
    %c2_21 = arith.constant 2 : index
    %c0_22 = arith.constant 0 : index
    %c0_23 = arith.constant 0 : index
    %33 = vector.load %arg5[%c2_21, %c0_22, %c0_23] : memref<8x1x32xf32, #tpu.memory_space<vmem>>, vector<1x1x32xf32>
    %34 = vector.shape_cast %33 : vector<1x1x32xf32> to vector<1x32xf32>
    %35 = vector.broadcast %34 : vector<1x32xf32> to vector<8x32xf32>
    %36 = arith.addf %32, %35 : vector<8x32xf32>
    %37 = math.tanh %36 : vector<8x32xf32>
    %38 = arith.mulf %0, %37 : vector<8x32xf32>
    %39 = arith.addf %0, %38 : vector<8x32xf32>
    %40 = vector.extract_strided_slice %6 {offsets = [0, 96], sizes = [8, 32], strides = [1, 1]} : vector<8x256xf32> to vector<8x32xf32>
    %c3 = arith.constant 3 : index
    %c0_24 = arith.constant 0 : index
    %c0_25 = arith.constant 0 : index
    %41 = vector.load %arg4[%c3, %c0_24, %c0_25] : memref<8x32x32xf32, #tpu.memory_space<vmem>>, vector<1x32x32xf32>
    %42 = vector.shape_cast %41 : vector<1x32x32xf32> to vector<32x32xf32>
    %cst_26 = arith.constant dense<0.000000e+00> : vector<8x32xf32>
    %43 = tpu.matmul %40, %42, %cst_26 {dimension_numbers = #tpu.dot_dimension_numbers<[1], [0], [0], [1], [0, 0, 1, 1], [], []>} : vector<8x32xf32>, vector<32x32xf32>, vector<8x32xf32> -> vector<8x32xf32>
    %c3_27 = arith.constant 3 : index
    %c0_28 = arith.constant 0 : index
    %c0_29 = arith.constant 0 : index
    %44 = vector.load %arg5[%c3_27, %c0_28, %c0_29] : memref<8x1x32xf32, #tpu.memory_space<vmem>>, vector<1x1x32xf32>
    %45 = vector.shape_cast %44 : vector<1x1x32xf32> to vector<1x32xf32>
    %46 = vector.broadcast %45 : vector<1x32xf32> to vector<8x32xf32>
    %47 = arith.addf %43, %46 : vector<8x32xf32>
    %48 = math.tanh %47 : vector<8x32xf32>
    %49 = arith.mulf %0, %48 : vector<8x32xf32>
    %50 = arith.addf %0, %49 : vector<8x32xf32>
    %51 = vector.extract_strided_slice %6 {offsets = [0, 128], sizes = [8, 32], strides = [1, 1]} : vector<8x256xf32> to vector<8x32xf32>
    %c4 = arith.constant 4 : index
    %c0_30 = arith.constant 0 : index
    %c0_31 = arith.constant 0 : index
    %52 = vector.load %arg4[%c4, %c0_30, %c0_31] : memref<8x32x32xf32, #tpu.memory_space<vmem>>, vector<1x32x32xf32>
    %53 = vector.shape_cast %52 : vector<1x32x32xf32> to vector<32x32xf32>
    %cst_32 = arith.constant dense<0.000000e+00> : vector<8x32xf32>
    %54 = tpu.matmul %51, %53, %cst_32 {dimension_numbers = #tpu.dot_dimension_numbers<[1], [0], [0], [1], [0, 0, 1, 1], [], []>} : vector<8x32xf32>, vector<32x32xf32>, vector<8x32xf32> -> vector<8x32xf32>
    %c4_33 = arith.constant 4 : index
    %c0_34 = arith.constant 0 : index
    %c0_35 = arith.constant 0 : index
    %55 = vector.load %arg5[%c4_33, %c0_34, %c0_35] : memref<8x1x32xf32, #tpu.memory_space<vmem>>, vector<1x1x32xf32>
    %56 = vector.shape_cast %55 : vector<1x1x32xf32> to vector<1x32xf32>
    %57 = vector.broadcast %56 : vector<1x32xf32> to vector<8x32xf32>
    %58 = arith.addf %54, %57 : vector<8x32xf32>
    %59 = math.tanh %58 : vector<8x32xf32>
    %60 = arith.mulf %0, %59 : vector<8x32xf32>
    %61 = arith.addf %0, %60 : vector<8x32xf32>
    %62 = vector.extract_strided_slice %6 {offsets = [0, 160], sizes = [8, 32], strides = [1, 1]} : vector<8x256xf32> to vector<8x32xf32>
    %c5 = arith.constant 5 : index
    %c0_36 = arith.constant 0 : index
    %c0_37 = arith.constant 0 : index
    %63 = vector.load %arg4[%c5, %c0_36, %c0_37] : memref<8x32x32xf32, #tpu.memory_space<vmem>>, vector<1x32x32xf32>
    %64 = vector.shape_cast %63 : vector<1x32x32xf32> to vector<32x32xf32>
    %cst_38 = arith.constant dense<0.000000e+00> : vector<8x32xf32>
    %65 = tpu.matmul %62, %64, %cst_38 {dimension_numbers = #tpu.dot_dimension_numbers<[1], [0], [0], [1], [0, 0, 1, 1], [], []>} : vector<8x32xf32>, vector<32x32xf32>, vector<8x32xf32> -> vector<8x32xf32>
    %c5_39 = arith.constant 5 : index
    %c0_40 = arith.constant 0 : index
    %c0_41 = arith.constant 0 : index
    %66 = vector.load %arg5[%c5_39, %c0_40, %c0_41] : memref<8x1x32xf32, #tpu.memory_space<vmem>>, vector<1x1x32xf32>
    %67 = vector.shape_cast %66 : vector<1x1x32xf32> to vector<1x32xf32>
    %68 = vector.broadcast %67 : vector<1x32xf32> to vector<8x32xf32>
    %69 = arith.addf %65, %68 : vector<8x32xf32>
    %70 = math.tanh %69 : vector<8x32xf32>
    %71 = arith.mulf %0, %70 : vector<8x32xf32>
    %72 = arith.addf %0, %71 : vector<8x32xf32>
    %73 = vector.extract_strided_slice %6 {offsets = [0, 192], sizes = [8, 32], strides = [1, 1]} : vector<8x256xf32> to vector<8x32xf32>
    %c6 = arith.constant 6 : index
    %c0_42 = arith.constant 0 : index
    %c0_43 = arith.constant 0 : index
    %74 = vector.load %arg4[%c6, %c0_42, %c0_43] : memref<8x32x32xf32, #tpu.memory_space<vmem>>, vector<1x32x32xf32>
    %75 = vector.shape_cast %74 : vector<1x32x32xf32> to vector<32x32xf32>
    %cst_44 = arith.constant dense<0.000000e+00> : vector<8x32xf32>
    %76 = tpu.matmul %73, %75, %cst_44 {dimension_numbers = #tpu.dot_dimension_numbers<[1], [0], [0], [1], [0, 0, 1, 1], [], []>} : vector<8x32xf32>, vector<32x32xf32>, vector<8x32xf32> -> vector<8x32xf32>
    %c6_45 = arith.constant 6 : index
    %c0_46 = arith.constant 0 : index
    %c0_47 = arith.constant 0 : index
    %77 = vector.load %arg5[%c6_45, %c0_46, %c0_47] : memref<8x1x32xf32, #tpu.memory_space<vmem>>, vector<1x1x32xf32>
    %78 = vector.shape_cast %77 : vector<1x1x32xf32> to vector<1x32xf32>
    %79 = vector.broadcast %78 : vector<1x32xf32> to vector<8x32xf32>
    %80 = arith.addf %76, %79 : vector<8x32xf32>
    %81 = math.tanh %80 : vector<8x32xf32>
    %82 = arith.mulf %0, %81 : vector<8x32xf32>
    %83 = arith.addf %0, %82 : vector<8x32xf32>
    %84 = vector.extract_strided_slice %6 {offsets = [0, 224], sizes = [8, 32], strides = [1, 1]} : vector<8x256xf32> to vector<8x32xf32>
    %c7 = arith.constant 7 : index
    %c0_48 = arith.constant 0 : index
    %c0_49 = arith.constant 0 : index
    %85 = vector.load %arg4[%c7, %c0_48, %c0_49] : memref<8x32x32xf32, #tpu.memory_space<vmem>>, vector<1x32x32xf32>
    %86 = vector.shape_cast %85 : vector<1x32x32xf32> to vector<32x32xf32>
    %cst_50 = arith.constant dense<0.000000e+00> : vector<8x32xf32>
    %87 = tpu.matmul %84, %86, %cst_50 {dimension_numbers = #tpu.dot_dimension_numbers<[1], [0], [0], [1], [0, 0, 1, 1], [], []>} : vector<8x32xf32>, vector<32x32xf32>, vector<8x32xf32> -> vector<8x32xf32>
    %c7_51 = arith.constant 7 : index
    %c0_52 = arith.constant 0 : index
    %c0_53 = arith.constant 0 : index
    %88 = vector.load %arg5[%c7_51, %c0_52, %c0_53] : memref<8x1x32xf32, #tpu.memory_space<vmem>>, vector<1x1x32xf32>
    %89 = vector.shape_cast %88 : vector<1x1x32xf32> to vector<1x32xf32>
    %90 = vector.broadcast %89 : vector<1x32xf32> to vector<8x32xf32>
    %91 = arith.addf %87, %90 : vector<8x32xf32>
    %92 = math.tanh %91 : vector<8x32xf32>
    %93 = arith.mulf %0, %92 : vector<8x32xf32>
    %94 = arith.addf %0, %93 : vector<8x32xf32>
    %95 = tpu.concatenate %17, %28, %39, %50, %61, %72, %83, %94 in 1 : vector<8x32xf32>, vector<8x32xf32>, vector<8x32xf32>, vector<8x32xf32>, vector<8x32xf32>, vector<8x32xf32>, vector<8x32xf32>, vector<8x32xf32> -> vector<8x256xf32>
    %c0_54 = arith.constant 0 : index
    %c0_55 = arith.constant 0 : index
    %96 = vector.load %arg6[%c0_54, %c0_55] : memref<8x256xf32, #tpu.memory_space<vmem>>, vector<8x256xf32>
    tpu.vector_store %arg6[%c0_54, %c0_55], %95 {strides = array<i32>} : memref<8x256xf32, #tpu.memory_space<vmem>>, vector<8x256xf32>,
    return
  }
  func.func @transform_0(%arg0: i32) -> (i32, i32) {
    %c0_i32 = arith.constant 0 : i32
    %c0_i32_0 = arith.constant 0 : i32
    return %arg0, %c0_i32 : i32, i32
  }
  func.func @transform_1(%arg0: i32) -> (i32, i32) {
    %c0_i32 = arith.constant 0 : i32
    %c0_i32_0 = arith.constant 0 : i32
    %c0_i32_1 = arith.constant 0 : i32
    return %c0_i32, %c0_i32_0 : i32, i32
  }
  func.func @transform_2(%arg0: i32) -> (i32, i32) {
    %c0_i32 = arith.constant 0 : i32
    %c0_i32_0 = arith.constant 0 : i32
    %c0_i32_1 = arith.constant 0 : i32
    return %c0_i32, %c0_i32_0 : i32, i32
  }
  func.func @transform_3(%arg0: i32) -> (i32, i32, i32) {
    %c0_i32 = arith.constant 0 : i32
    %c0_i32_0 = arith.constant 0 : i32
    %c0_i32_1 = arith.constant 0 : i32
    %c0_i32_2 = arith.constant 0 : i32
    return %c0_i32, %c0_i32_0, %c0_i32_1 : i32, i32, i32
  }
  func.func @transform_4(%arg0: i32) -> (i32, i32, i32) {
    %c0_i32 = arith.constant 0 : i32
    %c0_i32_0 = arith.constant 0 : i32
    %c0_i32_1 = arith.constant 0 : i32
    %c0_i32_2 = arith.constant 0 : i32
    return %c0_i32, %c0_i32_0, %c0_i32_1 : i32, i32, i32
  }
  func.func @transform_5(%arg0: i32) -> (i32, i32) {
    %c0_i32 = arith.constant 0 : i32
    %c0_i32_0 = arith.constant 0 : i32
    return %arg0, %c0_i32 : i32, i32
  }
}

</mosaic_0001>

<bundles_post_ra>
// kernel: tpu_custom_call.1
= control target key start
LH: loop header
LB: loop body
LE: loop exit
PB: predicated region body
PF: predicated region fallthrough
CT: control target
= control target key end

     0   :  { %10 = vsyncpa [#allocation3], 0  ;;  %s1449_s0 = inlined_call_operand.hbm [shape: f32[16,32], index: 0, kind: input, shape index: {}]   ;;  %s1450_s1 = inlined_call_operand.hbm [shape: f32[32,256], index: 1, kind: input, shape index: {}]   ;;  %s1451_s2 = inlined_call_operand.hbm [shape: f32[1,256], index: 2, kind: input, shape index: {}]   ;;  %s1452_s3 = inlined_call_operand.hbm [shape: f32[8,32,32], index: 3, kind: input, shape index: {}]   ;;  %s1453_s4 = inlined_call_operand.hbm [shape: f32[8,1,32], index: 4, kind: input, shape index: {}]   ;;  %s1454_s5 = inlined_call_operand.hbm [shape: f32[16,256], index: 5, kind: output, shape index: {}]  }
   0x1   :  { %12 = vsyncpa [#allocation3 + $0x1], 0 }
   0x2   :  { %13 = vsyncpa [#allocation6], 0 }
   0x3   :  { %14 = vsyncpa [#allocation9], 0 }
   0x4   :  { %15 = vsyncpa [#allocation4], 0 }
   0x5   :  { %17 = vsyncpa [#allocation4 + $0x1], 0  ;;  %s1241_s18 = smov 0   ;;  %s1243_s19 = smov 0  }
   0x6   :  { %s1245_s20 = smov 0   ;;  %s1247_s21 = smov 0  }
   0x7 LB: > { %s175_s24 = sshll.u32 %s1450_s1, 4  ;;  %s1265_s25 = sadd.s32 4294967295, %s1197_s21   ;;  %s1197_s21 = sphi %s1247_s21, %s1465_s21   ;;  %s1193_s20 = sphi %s1245_s20, %s1464_s20   ;;  %s1189_s19 = sphi %s1243_s19, %s1463_s19   ;;  %s1185_s18 = sphi %s1241_s18, %s1462_s18   ;;  %s176_s24 = int_to_ptr.hbm [resolvable:$true] %s175_s24 }
   0x8   : > { %p819_p0 = scmp.ge.s32.totalorder %s1197_s21, 1  ;;  %p44_p1 = scmp.eq.s32.totalorder %s1265_s25, 0 }
   0x9   : > { %p164_p2 = scmp.lt.s32.totalorder %s1197_s21, 3  ;;  %s1199_s27 = smov [#allocation5]  }
   0xa   : > { %s177_s28 = sshll.u32 %s1199_s27, 4  ;;  %s201_s6 = sshll.u32 %s1452_s3, 4  ;;  %s178_s28 = int_to_ptr.vmem [resolvable:$true] %s177_s28  ;;  %s202_s6 = int_to_ptr.hbm [resolvable:$true] %s201_s6 }
   0xb   : > { %p1270_p3 = pnand %p819_p0, %p164_p2  ;;  %s1200_s8 = smov [#allocation8]  }
   0xc   : > { %s203_s9 = sshll.u32 %s1200_s8, 4  ;;  %s1201_s10 = smov 256   ;;  %s204_s9 = int_to_ptr.vmem [resolvable:$true] %s203_s9 }
   0xd   : > { %p870_p4 = pneg %p1270_p3  ;;  %s1202_s11 = smov 16  }
   0xe   : > { %s1203_s12 = smov 128   ;;  %s1204_s13 = smov 8  }
   0xf   : > { %p1282_p6 = pnand %p870_p4, %p44_p1  ;;  %s190_s16 = sshll.u32 %s1451_s2, 4  ;;  %s191_s16 = int_to_ptr.hbm [resolvable:$true] %s190_s16 }
  0x10   : > { %s1205_s17 = smov [#allocation7]   ;;  %s215_s27 = sshll.u32 %s1453_s4, 4  ;;  %s216_s27 = int_to_ptr.hbm [resolvable:$true] %s215_s27 }
  0x11   : > { %873 = dma.hbm_to_vmem [thread:$0]  (!%p1282_p6), %s176_s24, 1024, %s178_s28, [#allocation6], %s1201_s10, %s1201_s10, %s1202_s11  }
  0x12   : > { %879 = dma.hbm_to_vmem [thread:$0]  (!%p1282_p6), %s202_s6, 4096, %s204_s9, [#allocation9], %s1203_s12, %s1203_s12, %s1204_s13  }
  0x13   : > { %s192_s22 = sshll.u32 %s1205_s17, 4  ;;  %s1206_s28 = smov [#allocation10]   ;;  %s193_s22 = int_to_ptr.vmem [resolvable:$true] %s192_s22 }
  0x14   : > { %876 = dma.hbm_to_vmem [thread:$0]  (!%p1282_p6), %s191_s16, 32, %s193_s22, [#allocation6]  }
  0x15   : > { %s217_s29 = sshll.u32 %s1206_s28, 4  ;;  %s1207_s30 = smov 1   ;;  %s218_s29 = int_to_ptr.vmem [resolvable:$true] %s217_s29 }
  0x16   : > { %882 = dma.hbm_to_vmem [thread:$0]  (!%p1282_p6), %s216_s27, 128, %s218_s29, [#allocation9], %s1202_s11, %s1202_s11, %s1207_s30  }
  0x17   : > { %s818_s6 = sadd.s32 4294967294, %s1197_s21   ;;  %s1302_s8 = sadd.s32 1, %s1197_s21  }
  0x18   : > { %s30_s9 = sadd.s32 1, %s1193_s20  ;;  %s27_s10 = ssub.s32 %s1197_s21, %s1302_s8 }
  0x19   : > { %p37_p7 = scmp.ne.s32.totalorder %s1193_s20, %s1189_s19  ;;  %p28_p8 = scmp.eq.s32.totalorder %s27_s10, 0 }
  0x1a   : > { %p38_p9 = scmp.eq.s32.totalorder %s1197_s21, 0  ;;  %p43_p10 = scmp.ne.s32.totalorder %s1189_s19, %s1185_s18 }
  0x1b   : > { %p151_p11 = scmp.eq.s32.totalorder %s1265_s25, 1  ;;  %p157_p0 = scmp.eq.s32.totalorder %s818_s6, 1 }
  0x1c   : > { %s1314_s12 = scalar_select %p28_p8, %s1193_s20, %s30_s9  }
  0x1d   : > { %p1318_p12 = por %p44_p1, %p43_p10  ;;  %p1322_p13 = por %p151_p11, %p37_p7 }
  0x1e   : > { %p39_p2 = por %p38_p9, %p37_p7  ;;  %s231_s13 = sand.u32 1, %s1193_s20  }
  0x1f   : > { %p1327_p4 = por %p157_p0, %p43_p10  ;;  %p895_p6 = scmp.lt.s32.totalorder %s1197_s21, 2 }
  0x20   : > { %s825_s15 = sshll.u32 %s231_s13, 3  ;;  %s826_s16 = sshll.u32 %s1197_s21, 3 }
  0x21   : > { %s239_s23 = scalar_lea.hbm %s1449_s0, %s826_s16  ;;  %s235_s27 = scalar_lea.vmem [#allocation2], %s825_s15 }
  0x22   : > { %s241_s24 = sshll.u32 %s239_s23, 4  ;;  %s243_s28 = sshll.u32 %s235_s27, 4  ;;  %s242_s24 = int_to_ptr.hbm [resolvable:$true] %s241_s24  ;;  %s244_s28 = int_to_ptr.vmem [resolvable:$true] %s243_s28 }
  0x23   : > { %p1336_p8 = pnand %p895_p6, %p39_p2  ;;  %s232_s30 = scalar_lea.sflag [#allocation3], %s231_s13 }
  0x24   : > { %s1093_s6 = sshra.s32 %s242_s24, 4  ;;  %s1100_s15 = scalar_lea.hbm %s1449_s0, 16  ;;  %s1094_s6 = int_to_ptr.hbm [resolvable:$true] %s1093_s6 }
  0x25   : > { %s1095_s9 = scalar_lea.hbm %s1094_s6, 8  ;;  %p1097_p9 = pneg %p1336_p8 }
  0x26   : > { %p1096_p7 = scmp.ne.s32.totalorder %s1094_s6, %s1095_s9  ;;  %p1101_p0 = scmp.lt.s32.totalorder %s1094_s6, %s1449_s0 }
  0x27   : > { %p1102_p2 = scmp.lt.s32.totalorder %s1100_s15, %s1095_s9 }
  0x28   : > { %p1098_p10 = pnand %p1097_p9, %p1096_p7 }
  0x29   : > { %p1103_p6 = por %p1102_p2, %p1101_p0 }
  0x2a   : > { %p1099_p11 = pneg %p1098_p10 }
  0x2c   : > { %p1104_p5 = pnand %p1103_p6, %p1099_p11 }
  0x2e   : > { %1107 = shalt.err (!%p1104_p5)
}
  0x2f   : > { %886 = dma.hbm_to_vmem [thread:$0]  (!%p1336_p8), %s242_s24, 128, %s244_s28, %s232_s30  }
  0x30   : > { %252 = sbr.rel (%p1270_p3) target bundleno = 596 (0x254), region = 40  ;;  %s1353_s13 = sand.u32 (!%p1270_p3), 1, %s1189_s19  }
  0x31   : > { %s828_s23 = sshll.u32 (!%p1270_p3), %s1353_s13, 3  ;;  %s255_s27 = scalar_lea.sflag (!%p1270_p3), [#allocation3], %s1353_s13 }
  0x32   : > { %s258_s10 = scalar_lea.vmem (!%p1270_p3), [#allocation2], %s828_s23 }
  0x35   : > { %1168 = dma.done.wait (%p1318_p12), %s255_s27, 128  }
  0x36   : > { %1170 = vsyncadd (%p1318_p12), %s255_s27, 4294967168 }
  0x37   : > { %1172 = dma.done.wait (%p44_p1), [#allocation6], 1056  }
  0x38   : > { %1174 = vsyncadd (%p44_p1), [#allocation6], 4294966240 }
  0x39   : > { %1176 = dma.done.wait (%p44_p1), [#allocation9], 4224  }
  0x3a   : > { %1178 = vsyncadd (%p44_p1), [#allocation9], 4294963072  ;;  %v313_v0 = vld [vmem:[#allocation5 + $0x30] sm:$0xff]  ;;  %v314_v1 = vld [vmem:[#allocation5 + $0x38] sm:$0xff]  ;;  %vm321_vm0 = vcmask 261120   ;;  %s1208_s26 = smov 32  }
  0x3b   : > { %v311_v2 = vld [vmem:[#allocation5 + $0x20] sm:$0xff]  ;;  %337 = vmatpush.msra.mxu0 %v313_v0  ;;  %357 = vmatpush.msra.mxu1 %v314_v1  ;;  %v312_v3 = vld [vmem:[#allocation5 + $0x28] sm:$0xff]  ;;  %v309_v4 = vld [vmem:[#allocation5 + $0x10] sm:$0xff]  ;;  %s1209_s7 = smov 96   ;;  %s1210_s24 = smov 64   ;;  %vm686_vm1 = vcmask 785408  }
  0x3c   : > { %v310_v5 = vld [vmem:[#allocation5 + $0x18] sm:$0xff]  ;;  %v307_v6 = vld [vmem:[#allocation5] sm:$0xff]  ;;  %v308_v7 = vld [vmem:[#allocation5 + $0x8] sm:$0xff]  ;;  %s833_s28 = sshll.u32 %s1353_s13, 4  ;;  %s849_s29 = sshll.u32 %s1265_s25, 4  ;;  %vm684_vm2 = vcmask 523264  }
  0x3d   : > { %338 = vmatpush.msra.mxu0 %v311_v2  ;;  %358 = vmatpush.msra.mxu1 %v312_v3  ;;  %v1369_v8 = vld [vmem:[%s258_s10] sm:$0xff]  ;;  %v367_v12 = vld [vmem:[#allocation8] sm:$0xff]  ;;  %v315_v17 = vld [vmem:[#allocation7] sm:$0x3]  ;;  %s705_s9 = scalar_lea.hbm %s1454_s5, %s849_s29  ;;  %s305_s25 = scalar_lea.vmem [#allocation11], %s833_s28 }
  0x3e   : > { %v370_v9 = vld [vmem:[#allocation8 + $0x18] sm:$0xff]  ;;  %v369_v10 = vld [vmem:[#allocation8 + $0x10] sm:$0xff]  ;;  %v368_v11 = vld [vmem:[#allocation8 + $0x8] sm:$0xff]  ;;  %v317_v18 = vperm.slane %v315_v17, 0  ;;  %v318_v19 = vperm.slane %v315_v17, 1  ;;  %s707_s16 = sshll.u32 %s305_s25, 4  ;;  %s708_s16 = int_to_ptr.vmem [resolvable:$true] %s707_s16 }
  0x3f   : > { %339 = vmatpush.msra.mxu0 %v309_v4  ;;  %359 = vmatpush.msra.mxu1 %v310_v5  ;;  %v516_v13 = vld [vmem:[#allocation8 + $0x98] sm:$0xff]  ;;  %v515_v14 = vld [vmem:[#allocation8 + $0x90] sm:$0xff]  ;;  %v514_v15 = vld [vmem:[#allocation8 + $0x88] sm:$0xff]  ;;  %s709_s15 = sshll.u32 %s705_s9, 4  ;;  %s694_s17 = scalar_lea.sflag [#allocation4], %s1353_s13  ;;  %s710_s15 = int_to_ptr.hbm [resolvable:$true] %s709_s15 }
  0x40   : > { %390 = vmatpush.msra.mxu2 %v370_v9  ;;  %v513_v16 = vld [vmem:[#allocation8 + $0x80] sm:$0xff]  ;;  %v405_v26 = vld [vmem:[#allocation8 + $0x38] sm:$0xff]  ;;  %v404_v28 = vld [vmem:[#allocation8 + $0x30] sm:$0xff]  ;;  %s1137_s22 = sshra.s32 %s710_s15, 4  ;;  %s1138_s22 = int_to_ptr.hbm [resolvable:$true] %s1137_s22 }
  0x41   : > { %340 = vmatpush.msra.mxu0 %v307_v6  ;;  %360 = vmatpush.msra.mxu1 %v308_v7  ;;  %v479_v27 = vld [vmem:[#allocation8 + $0x78] sm:$0xff]  ;;  %v478_v29 = vld [vmem:[#allocation8 + $0x70] sm:$0xff]  ;;  %v403_v30 = vld [vmem:[#allocation8 + $0x28] sm:$0xff]  ;;  %s1139_s23 = scalar_lea.hbm %s1138_s22, 16  ;;  %p1144_p12 = scmp.lt.s32.totalorder %s1138_s22, %s1454_s5 }
  0x42   : > { %834 = vmatmul.msk.f32.vlgmr.msra.gmra.mxu0 %vm321_vm0, %v1369_v8  ;;  %835 = vmatmul.msk.f32.vlgmr.msra.gmra.mxu1 %vm321_vm0, %v1369_v8  ;;  %v477_v31 = vld [vmem:[#allocation8 + $0x68] sm:$0xff]  ;;  %v402_v32 = vld [vmem:[#allocation8 + $0x20] sm:$0xff]  ;;  %v552_v34 = vld [vmem:[#allocation8 + $0xb8] sm:$0xff]  ;;  %p1140_p1 = scmp.ne.s32.totalorder %s1138_s22, %s1139_s23 }
  0x43   : > { %391 = vmatpush.msra.mxu2 %v369_v10  ;;  %427 = vmatpush.msra.mxu3 %v405_v26  ;;  %v476_v33 = vld [vmem:[#allocation8 + $0x60] sm:$0xff]  ;;  %v442_v35 = vld [vmem:[#allocation8 + $0x58] sm:$0xff]  ;;  %v551_v37 = vld [vmem:[#allocation8 + $0xb0] sm:$0xff] }
  0x44   : > { %501 = vmatpush.msrb.mxu1 %v479_v27  ;;  %v626_v36 = vld [vmem:[#allocation8 + $0xf8] sm:$0xff]  ;;  %464 = vmatpush.msrb.mxu0 %v442_v35  ;;  %v441_v38 = vld [vmem:[#allocation8 + $0x50] sm:$0xff]  ;;  %v550_v40 = vld [vmem:[#allocation8 + $0xa8] sm:$0xff]  ;;  %p1141_p3 = pnand %p1140_p1, %p1322_p13 }
  0x45   : > { %392 = vmatpush.msra.mxu2 %v368_v11  ;;  %428 = vmatpush.msra.mxu3 %v404_v28  ;;  %v625_v39 = vld [vmem:[#allocation8 + $0xf0] sm:$0xff]  ;;  %v440_v41 = vld [vmem:[#allocation8 + $0x48] sm:$0xff]  ;;  %v549_v43 = vld [vmem:[#allocation8 + $0xa0] sm:$0xff] }
  0x46   : > { %502 = vmatpush.msrb.mxu1 %v478_v29  ;;  %465 = vmatpush.msrb.mxu0 %v441_v38  ;;  %v624_v42 = vld [vmem:[#allocation8 + $0xe8] sm:$0xff]  ;;  %v439_v44 = vld [vmem:[#allocation8 + $0x40] sm:$0xff]  ;;  %v589_v46 = vld [vmem:[#allocation8 + $0xd8] sm:$0xff]  ;;  %p1142_p5 = pneg %p1141_p3 }
  0x47   : > { %393 = vmatpush.msra.mxu2 %v367_v12  ;;  %429 = vmatpush.msra.mxu3 %v403_v30  ;;  %v623_v45 = vld [vmem:[#allocation8 + $0xe0] sm:$0xff]  ;;  %v588_v47 = vld [vmem:[#allocation8 + $0xd0] sm:$0xff]  ;;  %v587_v48 = vld [vmem:[#allocation8 + $0xc8] sm:$0xff] }
  0x48   : > { %503 = vmatpush.msrb.mxu1 %v477_v31  ;;  %466 = vmatpush.msrb.mxu0 %v440_v41  ;;  %v586_v49 = vld [vmem:[#allocation8 + $0xc0] sm:$0xff] }
  0x49   : > { %537 = vmatpush.msrb.mxu2 %v516_v13  ;;  %430 = vmatpush.msra.mxu3 %v402_v32  ;;  %v948_v57 = vld [vmem:[#allocation10 + $0x1] ss:$0 sm:$0xff]  ;;  %v949_v58 = vld [vmem:[#allocation10 + $0x2] ss:$0 sm:$0xff]  ;;  %v950_v61 = vld [vmem:[#allocation10 + $0x7] ss:$0 sm:$0xff] }
  0x4a   : > { %504 = vmatpush.msrb.mxu1 %v476_v33  ;;  %467 = vmatpush.msrb.mxu0 %v439_v44  ;;  %v951_v2 = vld [vmem:[#allocation10 + $0x5] ss:$0 sm:$0xff]  ;;  %v947_v3 = vld [vmem:[#allocation10 + $0x3] ss:$0 sm:$0xff]  ;;  %v952_v4 = vld [vmem:[#allocation10 + $0x6] ss:$0 sm:$0xff] }
  0x4b   : > { %538 = vmatpush.msrb.mxu2 %v515_v14  ;;  %574 = vmatpush.msrb.mxu3 %v552_v34  ;;  %v946_v30 = vld [vmem:[#allocation10 + $0x4] ss:$0 sm:$0xff]  ;;  %v945_v32 = vld [vmem:[#allocation10] ss:$0 sm:$0xff] }
  0x4c   : > { %648 = vmatpush.msra.mxu1 %v626_v36  ;;  %611 = vmatpush.msra.mxu0 %v589_v46 }
  0x4d   : > { %539 = vmatpush.msrb.mxu2 %v514_v15  ;;  %575 = vmatpush.msrb.mxu3 %v551_v37 }
  0x4e   : > { %649 = vmatpush.msra.mxu1 %v625_v39  ;;  %612 = vmatpush.msra.mxu0 %v588_v47 }
  0x4f   : > { %540 = vmatpush.msrb.mxu2 %v513_v16  ;;  %576 = vmatpush.msrb.mxu3 %v550_v40 }
  0x50   : > { %650 = vmatpush.msra.mxu1 %v624_v42  ;;  %613 = vmatpush.msra.mxu0 %v587_v48 }
  0x51   : > { %577 = vmatpush.msrb.mxu3 %v549_v43 }
  0x52   : > { %651 = vmatpush.msra.mxu1 %v623_v45  ;;  %614 = vmatpush.msra.mxu0 %v586_v49 }
  0xbf   : > { %v342_v20 = vpop.f32.mrf.mxu0  ;;  %v362_v21 = vpop.f32.mrf.mxu1 }
  0xc0   : > { %v343_v22 = vadd.f32 %v342_v20, %v317_v18  ;;  %v363_v23 = vadd.f32 %v362_v21, %v318_v19 }
  0xc2   : > { %953 = vtanh.f32 %v343_v22 }
  0xc3   : > { %955 = vtanh.f32 %v363_v23 }
  0xc8   : > { %v954_v24 = vpop.eup %953 }
  0xc9   : > { %v956_v25 = vpop.eup %955  ;;  %485 = vrot.lane.b32.xlu1 %v954_v24, %s1208_s26  ;;  %411 = vrot.lane.b32.xlu0 %v954_v24, %s1209_s7 }
  0xca   : > { %595 = vrot.lane.b32.xlu2 %v956_v25, %s1210_s24  ;;  %836 = vmatmul.msk.f32.vlgmr.msra.gmra.mxu2 %vm321_vm0, %v954_v24 }
  0xd1   : > { %558 = vrot.lane.b32.xlu1 %v956_v25, %s1209_s7  ;;  %448 = vrot.lane.b32.xlu0 %v954_v24, %s1210_s24 }
  0xd2   : > { %632 = vrot.lane.b32.xlu2 %v956_v25, %s1208_s26  ;;  %840 = vmatmul.msk.f32.vlgmr.msrb.gmra.mxu2 %vm321_vm0, %v956_v25 }
 0x124   : > { %v596_v50 = vpop.permute.xlu2 %595 }
 0x12c   : > { %v633_v55 = vpop.permute.xlu2 %632 }
 0x13b   : > { %v486_v51 = vpop.permute.xlu1 %485  ;;  %v412_v52 = vpop.permute.xlu0 %411 }
 0x13c   : > { %837 = vmatmul.msk.f32.vlgmr.msra.gmra.mxu3 %vm321_vm0, %v412_v52  ;;  %839 = vmatmul.msk.f32.vlgmr.msrb.gmra.mxu1 %vm321_vm0, %v486_v51 }
 0x143   : > { %v559_v53 = vpop.permute.xlu1 %558  ;;  %v449_v54 = vpop.permute.xlu0 %448 }
 0x144   : > { %838 = vmatmul.msk.f32.vlgmr.msrb.gmra.mxu0 %vm321_vm0, %v449_v54  ;;  %841 = vmatmul.msk.f32.vlgmr.msrb.gmra.mxu3 %vm321_vm0, %v559_v53 }
 0x145   : > { %843 = vmatmul.msk.f32.vlgmr.msra.gmra.mxu1 %vm321_vm0, %v633_v55 }
 0x14c   : > { %842 = vmatmul.msk.f32.vlgmr.msra.gmra.mxu0 %vm321_vm0, %v596_v50 }
 0x14d   : > { %v395_v29 = vpop.f32.mrf.mxu2 }
 0x14e   : > { %v396_v34 = vadd.f32 %v945_v32, %v395_v29 }
 0x155   : > { %v542_v31 = vpop.f32.mrf.mxu2 }
 0x156   : > { %v543_v33 = vadd.f32 %v946_v30, %v542_v31 }
 0x1b9   : > { %v506_v56 = vpop.f32.mrf.mxu1 }
 0x1ba   : > { %v507_v12 = vadd.f32 %v947_v3, %v506_v56 }
 0x1bf   : > { %v432_v59 = vpop.f32.mrf.mxu3 }
 0x1c0   : > { %v433_v60 = vadd.f32 %v948_v57, %v432_v59 }
 0x1c1   : > { %v469_v62 = vpop.f32.mrf.mxu0 }
 0x1c2   : > { %957 = vtanh.f32 %v433_v60  ;;  %v470_v63 = vadd.f32 %v949_v58, %v469_v62  ;;  %v653_v0 = vpop.f32.mrf.mxu1 }
 0x1c3   : > { %v654_v1 = vadd.f32 %v950_v61, %v653_v0 }
 0x1c4   : > { %959 = vtanh.f32 %v470_v63 }
 0x1c5   : > { %961 = vtanh.f32 %v654_v1 }
 0x1c7   : > { %v579_v5 = vpop.f32.mrf.mxu3 }
 0x1c8   : > { %v958_v6 = vpop.eup %957  ;;  %v580_v7 = vadd.f32 %v951_v2, %v579_v5 }
 0x1c9   : > { %v616_v9 = vpop.f32.mrf.mxu0  ;;  %v436_v10 = vmul.f32 %v958_v6, %v1369_v8 }
 0x1ca   : > { %v960_v11 = vpop.eup %959  ;;  %963 = vtanh.f32 %v580_v7  ;;  %v617_v13 = vadd.f32 %v952_v4, %v616_v9 }
 0x1cb   : > { %v437_v14 = vadd.f32 %v436_v10, %v1369_v8  ;;  %v473_v15 = vmul.f32 %v960_v11, %v1369_v8  ;;  %v962_v17 = vpop.eup %961 }
 0x1cc   : > { %965 = vtanh.f32 %v617_v13  ;;  %v657_v20 = vmul.f32 %v962_v17, %v1369_v8 }
 0x1cd   : > { %660 = vrot.lane.b32.xlu0 %v437_v14, %s1208_s26  ;;  %v474_v16 = vadd.f32 %v473_v15, %v1369_v8  ;;  %967 = vtanh.f32 %v507_v12 }
 0x1ce   : > { %v658_v26 = vadd.f32 %v657_v20, %v1369_v8  ;;  %969 = vtanh.f32 %v543_v33 }
 0x1cf   : > { %664 = vrot.lane.b32.xlu2 %v474_v16, %s1210_s24  ;;  %971 = vtanh.f32 %v396_v34 }
 0x1d0   : > { %v964_v18 = vpop.eup %963 }
 0x1d1   : > { %v583_v19 = vmul.f32 %v964_v18, %v1369_v8 }
 0x1d2   : > { %v966_v21 = vpop.eup %965 }
 0x1d3   : > { %v584_v22 = vadd.f32 %v583_v19, %v1369_v8  ;;  %v620_v23 = vmul.f32 %v966_v21, %v1369_v8  ;;  %v968_v24 = vpop.eup %967 }
 0x1d4   : > { %v510_v27 = vmul.f32 %v968_v24, %v1369_v8  ;;  %v970_v35 = vpop.eup %969 }
 0x1d5   : > { %672 = vrot.lane.b32.xlu1 %v584_v22, %s1208_s26  ;;  %v621_v25 = vadd.f32 %v620_v23, %v1369_v8  ;;  %v546_v38 = vmul.f32 %v970_v35, %v1369_v8  ;;  %v972_v39 = vpop.eup %971  ;;  %s1143_s26 = scalar_lea.hbm %s1454_s5, 32 }
 0x1d6   : > { %v511_v28 = vadd.f32 %v510_v27, %v1369_v8  ;;  %v399_v40 = vmul.f32 %v972_v39, %v1369_v8  ;;  %p1145_p8 = scmp.lt.s32.totalorder %s1143_s26, %s1139_s23 }
 0x1d7   : > { %676 = vrot.lane.b32.xlu0 %v621_v25, %s1210_s24  ;;  %680 = vrot.lane.b32.xlu2 %v658_v26, %s1209_s7  ;;  %v547_v41 = vadd.f32 %v546_v38, %v1369_v8 }
 0x1d8   : > { %v400_v46 = vadd.f32 %v399_v40, %v1369_v8  ;;  %p1146_p7 = por %p1145_p8, %p1144_p12 }
 0x1da   : > { %p1147_p9 = pnand %p1146_p7, %p1142_p5 }
 0x1dd   : > { %668 = vrot.lane.b32.xlu1 %v511_v28, %s1209_s7 }
 0x229   : > { %v665_v36 = vpop.permute.xlu2 %664 }
 0x231   : > { %v681_v45 = vpop.permute.xlu2 %680 }
 0x23f   : > { %v661_v37 = vpop.permute.xlu0 %660 }
 0x240   : > { %v683_v49 = vsel %vm321_vm0, %v400_v46, %v661_v37 }
 0x241   : > { %v685_v51 = vsel %vm684_vm2, %v683_v49, %v665_v36 }
 0x247   : > { %v673_v42 = vpop.permute.xlu1 %672 }
 0x248   : > { %v688_v43 = vsel %vm321_vm0, %v547_v41, %v673_v42 }
 0x249   : > { %v677_v44 = vpop.permute.xlu0 %676 }
 0x24a   : > { %v689_v47 = vsel %vm684_vm2, %v688_v43, %v677_v44 }
 0x24b   : > { %v690_v48 = vsel %vm686_vm1, %v689_v47, %v681_v45 }
 0x24c   : > { %692 = vst [vmem:[%s305_s25 + $0x8] sm:$0xff] %v690_v48 }
 0x24f   : > { %v669_v50 = vpop.permute.xlu1 %668 }
 0x250   : > { %v687_v52 = vsel %vm686_vm1, %v685_v51, %v669_v50 }
 0x251   : > { %691 = vst [vmem:[%s305_s25] sm:$0xff] %v687_v52 }
 0x252   : > { %1150 = shalt.err (!%p1147_p9)
}
 0x253   : > { %868 = dma.vmem_to_hbm [thread:$0]  (%p1322_p13), %s708_s16, 256, %s710_s15, %s694_s17  }
 0x254 PF: > { %s721_s13 = sand.u32 1, %s1185_s18   ;;  %p1461_p10 = scmp.ge.s32.totalorder %s1197_s21, 2 }
 0x255   : > { %s722_s28 = scalar_lea.sflag [#allocation4], %s721_s13 }
 0x256   : > { %p888_p11 = pnand %p1461_p10, %p1327_p4 }
 0x258   : > { %p889_p0 = pneg %p888_p11 }
 0x25a   : > { %1180 = dma.done.wait (%p889_p0), %s722_s28, 256  }
 0x25b   : > { %1182 = vsyncadd (%p889_p0), %s722_s28, 4294967040  ;;  %p20_p2 = scmp.ge.s32.totalorder %s1302_s8, 4   ;;  %s1462_s18 = smov %s1189_s19 }
 0x25c   : > { %s1463_s19 = smov %s1193_s20  ;;  %s1464_s20 = smov %s1314_s12 }
 0x25d   : > { %s1465_s21 = smov %s1302_s8  ;;  %22 = sbr.rel (!%p20_p2) target bundleno = 7 (0x7), region = 115 }
 0x262   :  { %728 = vsyncpa [#allocation3], 1 }
 0x263   :  { %730 = vsyncpa [#allocation3 + $0x1], 1 }
 0x264   :  { %731 = vsyncpa [#allocation6], 1 }
 0x265   :  { %732 = vsyncpa [#allocation9], 1 }
 0x266   :  { %733 = vsyncpa [#allocation4], 1 }
 0x267   :  { %735 = vsyncpa [#allocation4 + $0x1], 1 }

</bundles_post_ra>
